<compile_context>
chip_gen: v7x
topology: tpu7x:2x2x1
jax: 0.10.0
libtpu: 0.0.40
codegen_flags: <defaults>
</compile_context>

<pallas_src>
import jax
import jax.numpy as jnp
from jax.experimental import pallas as pl
from jax.experimental.pallas import tpu as pltpu


def _round_up(a, m):
    return ((a + m - 1) // m) * m


def mlp_kernel(x_ref, w1_ref, b1_ref, w2_ref, b2_ref, o_ref):
    # Layer 1 on the MXU: (tm, K) @ (K, Hp) -> (tm, Hp), f32 accumulation.
    h = jnp.dot(x_ref[...], w1_ref[...], preferred_element_type=jnp.float32)
    h = jnp.maximum(h + b1_ref[...], 0.0)                 # bias + ReLU on the VPU
    # Layer 2 (out_features == 1): VPU multiply + XLU lane-reduce, skip the MXU.
    col = jnp.sum(h * w2_ref[...], axis=-1, keepdims=True) + b2_ref[0, 0]  # (tm, 1)
    # Lane-dense store: relayout the column to a (1, tm) row (idle XLU) so the
    # output block is unmasked along lanes and its VMEM buffer is tiny.
    o_ref[...] = jnp.transpose(col).astype(o_ref.dtype)


def fully_connected(x, w1, b1, w2, b2, *, tm=1024, cast_bf16=False):
    """y = relu(x @ w1.T + b1) @ w2.T + b2 with PyTorch nn.Linear layouts:
       x: (B, 300), w1: (100, 300), b1: (100,), w2: (1, 100), b2: (1,)."""
    B, K = x.shape
    H = w1.shape[0]
    Hp = pl.cdiv(H, 128) * 128  # pad hidden 100 -> 128: dense vregs, no mask ops

    # One-time parameter prep (tiny): transpose to (in, out) so the kernel does
    # x @ W directly, zero-pad the hidden dim, flatten the fc2 weight to a row.
    w1p = jnp.zeros((K, Hp), jnp.float32).at[:, :H].set(w1.T)
    b1p = jnp.zeros((1, Hp), jnp.float32).at[:, :H].set(b1)
    w2p = jnp.zeros((1, Hp), jnp.float32).at[:, :H].set(w2.reshape(1, H))
    b2p = b2.reshape(1, 1).astype(jnp.float32)

    xk = x
    if cast_bf16:
        # Optional v5e knob (faster MXU with bf16 operands). Accuracy typically
        # lands ~1e-3 relative at K=300 — re-validate tolerances before enabling.
        xk = x.astype(jnp.bfloat16)
        w1p = w1p.astype(jnp.bfloat16)

    # ---- batch tile selection ---------------------------------------------
    # Big tiles amortize the ~0.35 us per-grid-step overhead (mem-bound kernel);
    # cap at 2048 so double-buffered x (<= ~6.3 MB lane-padded) fits v5e's 16 MiB
    # scoped-VMEM default; keep >= 2 grid steps when possible for v7x megacore.
    if B <= 8:
        tm_eff = B
    else:
        tm_eff = max(8, (min(tm, 2048) // 8) * 8)                 # multiple of 8
        tm_eff = min(tm_eff, _round_up(pl.cdiv(B, 2), 8))         # >= 2 grid steps
    nt = pl.cdiv(B, tm_eff)
    grid = (nt,)

    flops = 2 * B * K * Hp + 5 * B * Hp
    bytes_accessed = 4 * (x.size + w1p.size + b1p.size + w2p.size + b2p.size
                          + nt * tm_eff)

    out = pl.pallas_call(
        mlp_kernel,
        out_shape=jax.ShapeDtypeStruct((nt, tm_eff), jnp.float32),
        grid=grid,
        in_specs=[
            # x streams over the batch grid (double-buffered by Pallas).
            pl.BlockSpec((tm_eff, K), lambda i: (i, 0)),
            # Weights / biases: same block every step -> resident in VMEM.
            pl.BlockSpec((K, Hp), lambda i: (0, 0)),
            pl.BlockSpec((1, Hp), lambda i: (0, 0)),
            pl.BlockSpec((1, Hp), lambda i: (0, 0)),
            # Scalar fc2 bias lives in SMEM.
            pl.BlockSpec(memory_space=pltpu.MemorySpace.SMEM),
        ],
        # Lane-dense (1, tm) output row per grid step.
        out_specs=pl.BlockSpec((1, tm_eff), lambda i: (i, 0)),
        compiler_params=pltpu.CompilerParams(
            dimension_semantics=("parallel",),  # megacore sharding on v7x
        ),
        cost_estimate=pl.CostEstimate(
            flops=flops, transcendentals=0, bytes_accessed=bytes_accessed),
    )(xk, w1p, b1p, w2p, b2p)

    # Undo the row-major output slab: (nt, tm) -> (B, 1); padded rows discarded.
    return out.reshape(nt * tm_eff)[:B].reshape(B, 1)


def init_params(key):
    """PyTorch nn.Linear default init: U(-1/sqrt(fan_in), 1/sqrt(fan_in)),
    weights stored PyTorch-style as (out_features, in_features)."""
    k1, k2, k3, k4 = jax.random.split(key, 4)
    in1, out1 = 300, 100
    in2, out2 = 100, 1
    bound1 = 1.0 / jnp.sqrt(jnp.float32(in1))
    bound2 = 1.0 / jnp.sqrt(jnp.float32(in2))
    w1 = jax.random.uniform(k1, (out1, in1), jnp.float32, -bound1, bound1)
    b1 = jax.random.uniform(k2, (out1,), jnp.float32, -bound1, bound1)
    w2 = jax.random.uniform(k3, (out2, in2), jnp.float32, -bound2, bound2)
    b2 = jax.random.uniform(k4, (out2,), jnp.float32, -bound2, bound2)
    return w1, b1, w2, b2


def reference(x, w1, b1, w2, b2):
    h = jnp.maximum(x @ w1.T + b1, 0.0)
    return h @ w2.T + b2


if __name__ == "__main__":
    key = jax.random.PRNGKey(0)
    kx, kp = jax.random.split(key)
    B = 8
    x = jax.random.normal(kx, (B, 300), jnp.float32)
    w1, b1, w2, b2 = init_params(kp)

    out = fully_connected(x, w1, b1, w2, b2)
    out = jax.block_until_ready(out)

    ref = reference(x, w1, b1, w2, b2)
    assert out.shape == (B, 1)
    assert jnp.allclose(out, ref, atol=1e-4, rtol=1e-4)
    print("KERNEL_OK")
</pallas_src>

<mosaic_0001>
module attributes {stable_mosaic.version = 11 : i64} {
  func.func @mlp_kernel(%arg0: i32, %arg1: memref<8x300xf32, #tpu.memory_space<vmem>>, %arg2: memref<300x128xf32, #tpu.memory_space<vmem>>, %arg3: memref<1x128xf32, #tpu.memory_space<vmem>>, %arg4: memref<1x128xf32, #tpu.memory_space<vmem>>, %arg5: memref<1x1xf32, #tpu.memory_space<smem>>, %arg6: memref<1x8xf32, #tpu.memory_space<vmem>>) attributes {dimension_semantics = [#tpu.dimension_semantics<parallel>], iteration_bounds = array<i64: 1>, scalar_prefetch = 0 : i64, scratch_operands = 0 : i64, tpu.core_type = #tpu.core_type<tc>, window_params = [{transform_indices = @transform_0, window_bounds = array<i64: 8, 300>}, {pipeline_mode = #tpu.pipeline_mode<synchronous>, transform_indices = @transform_1, window_bounds = array<i64: 300, 128>}, {pipeline_mode = #tpu.pipeline_mode<synchronous>, transform_indices = @transform_2, window_bounds = array<i64: 1, 128>}, {pipeline_mode = #tpu.pipeline_mode<synchronous>, transform_indices = @transform_3, window_bounds = array<i64: 1, 128>}, {transform_indices = @transform_4, window_bounds = array<i64: 1, 1>}, {transform_indices = @transform_5, window_bounds = array<i64: 1, 8>}]} {
    %c0 = arith.constant 0 : index
    %c0_0 = arith.constant 0 : index
    %0 = vector.load %arg1[%c0, %c0_0] : memref<8x300xf32, #tpu.memory_space<vmem>>, vector<8x300xf32>
    %c0_1 = arith.constant 0 : index
    %c0_2 = arith.constant 0 : index
    %1 = vector.load %arg2[%c0_1, %c0_2] : memref<300x128xf32, #tpu.memory_space<vmem>>, vector<300x128xf32>
    %cst = arith.constant dense<0.000000e+00> : vector<8x128xf32>
    %2 = tpu.matmul %0, %1, %cst {dimension_numbers = #tpu.dot_dimension_numbers<[1], [0], [0], [1], [0, 0, 1, 1], [], []>} : vector<8x300xf32>, vector<300x128xf32>, vector<8x128xf32> -> vector<8x128xf32>
    %c0_3 = arith.constant 0 : index
    %c0_4 = arith.constant 0 : index
    %3 = vector.load %arg3[%c0_3, %c0_4] : memref<1x128xf32, #tpu.memory_space<vmem>>, vector<1x128xf32>
    %4 = vector.broadcast %3 : vector<1x128xf32> to vector<8x128xf32>
    %5 = arith.addf %2, %4 : vector<8x128xf32>
    %cst_5 = arith.constant 0.000000e+00 : f32
    %6 = vector.broadcast %cst_5 : f32 to vector<8x128xf32>
    %7 = arith.maximumf %5, %6 : vector<8x128xf32>
    %c0_6 = arith.constant 0 : index
    %c0_7 = arith.constant 0 : index
    %8 = vector.load %arg4[%c0_6, %c0_7] : memref<1x128xf32, #tpu.memory_space<vmem>>, vector<1x128xf32>
    %9 = vector.broadcast %8 : vector<1x128xf32> to vector<8x128xf32>
    %10 = arith.mulf %7, %9 : vector<8x128xf32>
    %cst_8 = arith.constant dense<0.000000e+00> : vector<8xf32>
    %11 = vector.multi_reduction <add>, %10, %cst_8 [1] : vector<8x128xf32> to vector<8xf32>
    %12 = vector.shape_cast %11 : vector<8xf32> to vector<8x1xf32>
    %c0_9 = arith.constant 0 : index
    %c0_10 = arith.constant 0 : index
    %13 = memref.load %arg5[%c0_9, %c0_10] : memref<1x1xf32, #tpu.memory_space<smem>>
    %14 = vector.broadcast %13 : f32 to vector<8x1xf32>
    %15 = arith.addf %12, %14 : vector<8x1xf32>
    %16 = tpu.transpose %15, [1, 0] : vector<8x1xf32> -> vector<1x8xf32>
    %c0_11 = arith.constant 0 : index
    %c0_12 = arith.constant 0 : index
    %17 = vector.load %arg6[%c0_11, %c0_12] : memref<1x8xf32, #tpu.memory_space<vmem>>, vector<1x8xf32>
    tpu.vector_store %arg6[%c0_11, %c0_12], %16 {strides = array<i32>} : memref<1x8xf32, #tpu.memory_space<vmem>>, vector<1x8xf32>,
    return
  }
  func.func @transform_0(%arg0: i32) -> (i32, i32) {
    %c0_i32 = arith.constant 0 : i32
    %c0_i32_0 = arith.constant 0 : i32
    return %arg0, %c0_i32 : i32, i32
  }
  func.func @transform_1(%arg0: i32) -> (i32, i32) {
    %c0_i32 = arith.constant 0 : i32
    %c0_i32_0 = arith.constant 0 : i32
    %c0_i32_1 = arith.constant 0 : i32
    return %c0_i32, %c0_i32_0 : i32, i32
  }
  func.func @transform_2(%arg0: i32) -> (i32, i32) {
    %c0_i32 = arith.constant 0 : i32
    %c0_i32_0 = arith.constant 0 : i32
    %c0_i32_1 = arith.constant 0 : i32
    return %c0_i32, %c0_i32_0 : i32, i32
  }
  func.func @transform_3(%arg0: i32) -> (i32, i32) {
    %c0_i32 = arith.constant 0 : i32
    %c0_i32_0 = arith.constant 0 : i32
    %c0_i32_1 = arith.constant 0 : i32
    return %c0_i32, %c0_i32_0 : i32, i32
  }
  func.func @transform_4(%arg0: i32) -> (i32, i32) {
    %c0_i32 = arith.constant 0 : i32
    %c0_i32_0 = arith.constant 0 : i32
    %c0_i32_1 = arith.constant 0 : i32
    return %c0_i32, %c0_i32_0 : i32, i32
  }
  func.func @transform_5(%arg0: i32) -> (i32, i32) {
    %c0_i32 = arith.constant 0 : i32
    %c0_i32_0 = arith.constant 0 : i32
    return %arg0, %c0_i32 : i32, i32
  }
}

</mosaic_0001>

<bundles_post_ra>
// kernel: tpu_custom_call.1
= control target key start
LH: loop header
LB: loop body
LE: loop exit
PB: predicated region body
PF: predicated region fallthrough
CT: control target
= control target key end

     0   :  { %11 = vsyncpa [#allocation4], 0  ;;  %s586_s0 = inlined_call_operand.hbm [shape: f32[8,300], index: 0, kind: input, shape index: {}]   ;;  %s587_s1 = inlined_call_operand.hbm [shape: f32[300,128], index: 1, kind: input, shape index: {}]   ;;  %s588_s2 = inlined_call_operand.vmem [shape: f32[1,128], index: 2, kind: input, shape index: {}]   ;;  %s589_s3 = inlined_call_operand.vmem [shape: f32[1,128], index: 3, kind: input, shape index: {}]   ;;  %s590_s4 = inlined_call_operand.<no memory space> [shape: f32[1,1], index: 4, kind: input, shape index: {}]   ;;  %s591_s5 = inlined_call_operand.hbm [shape: f32[1,8], index: 5, kind: output, shape index: {}]  }
   0x1   :  { %12 = vsyncpa [#allocation7], 0 }
   0x2   :  { %13 = vsyncpa [#allocation5], 0  ;;  %s492_s18 = smov [#allocation3]   ;;  %s493_s20 = smov [#allocation6]  }
   0x3   :  { %s20_s19 = sshll.u32 %s492_s18, 4  ;;  %s29_s21 = sshll.u32 %s493_s20, 4  ;;  %s21_s19 = int_to_ptr.vmem [resolvable:$true] %s20_s19  ;;  %s531_s21 = int_to_ptr.vmem [resolvable:$true] %s29_s21 }
   0x4   :  { %s420_s24 = scalar_lea.hbm %s586_s0, 384 }
   0x5   :  { %p421_p0 = scmp.ne.s32.totalorder %s586_s0, %s420_s24  ;;  %p424_p1 = scmp.lt.u32.totalorder %s420_s24, %s586_s0 }
   0x7   :  { %p426_p2 = pnand %p424_p1, %p421_p0 }
   0x9   :  { %429 = shalt.err (!%p426_p2)
}
   0xa   :  { %s430_s29 = scalar_lea.vmem %s21_s19, 384  ;;  %p435_p4 = scmp.lt.s32.totalorder %s21_s19, %s21_s19 }
   0xb   :  { %p431_p3 = scmp.ne.s32.totalorder %s21_s19, %s430_s29  ;;  %p436_p5 = scmp.lt.s32.totalorder %s430_s29, %s430_s29 }
   0xd   :  { %p437_p6 = por %p436_p5, %p435_p4 }
   0xf   :  { %p438_p7 = pnand %p437_p6, %p431_p3 }
  0x11   :  { %441 = shalt.err (!%p438_p7)
}
  0x12   :  { %23 = dma.hbm_to_vmem [thread:$0]  %s586_s0, 384, %s21_s19, [#allocation4]  }
  0x13   :  { %s442_s9 = scalar_lea.hbm %s587_s1, 4864 }
  0x14   :  { %p443_p8 = scmp.ne.s32.totalorder %s587_s1, %s442_s9  ;;  %p446_p9 = scmp.lt.u32.totalorder %s442_s9, %s587_s1 }
  0x16   :  { %p448_p10 = pnand %p446_p9, %p443_p8 }
  0x18   :  { %451 = shalt.err (!%p448_p10)
}
  0x19   :  { %s452_s14 = scalar_lea.vmem %s531_s21, 4864  ;;  %p457_p12 = scmp.lt.s32.totalorder %s531_s21, %s531_s21 }
  0x1a   :  { %p453_p11 = scmp.ne.s32.totalorder %s531_s21, %s452_s14  ;;  %p458_p13 = scmp.lt.s32.totalorder %s452_s14, %s452_s14 }
  0x1c   :  { %p459_p0 = por %p458_p13, %p457_p12 }
  0x1e   :  { %p460_p1 = pnand %p459_p0, %p453_p11 }
  0x20   :  { %463 = shalt.err (!%p460_p1)
}
  0x21   :  { %s494_s0 = smov 128   ;;  %s495_s15 = smov 8  }
  0x22   :  { %35 = dma.hbm_to_vmem [thread:$0]  %s587_s1, 4864, %s531_s21, [#allocation7], %s494_s0, %s494_s0, %s495_s15  }
  0x23   :  { %486 = dma.done.wait [#allocation4], 384  }
  0x24   :  { %487 = vsyncadd [#allocation4], 4294966912 }
  0x25   :  { %488 = dma.done.wait [#allocation7], 4864  }
  0x26   :  { %489 = vsyncadd [#allocation7], 4294962432  ;;  %v496_v0 = vmov 0.0|0.0   ;;  %vm497_vm0 = vmmov 0   ;;  %v498_v1 = vmov 0.0   ;;  %v67_v2 = vld [vmem:[#allocation6 + $0x80] sm:$0xff] }
  0x27   :  { %401 = vmatprep.subr.bf16.mxu1 %v496_v0  ;;  %366 = vmatprep.mubr.msk.f32.mxu1 %vm497_vm0, %v498_v1  ;;  %v68_v3 = vld [vmem:[#allocation6 + $0x88] sm:$0xff]  ;;  %v51_v4 = vld [vmem:[#allocation6] sm:$0xff]  ;;  %v69_v7 = vld [vmem:[#allocation6 + $0x90] sm:$0xff]  ;;  %vm100_vm1 = vcmask 1043456   ;;  %vm499_vm2 = vmmov 1   ;;  %vm96_vm4 = vcmask 359424  }
  0x28   :  { %v369_v5 = vpack.c.bf16 %v68_v3, %v67_v2  ;;  %v52_v6 = vld [vmem:[#allocation6 + $0x8] sm:$0xff]  ;;  %v70_v8 = vld [vmem:[#allocation6 + $0x98] sm:$0xff]  ;;  %v53_v11 = vld [vmem:[#allocation6 + $0x10] sm:$0xff]  ;;  %s500_s23 = smov [#allocation8]   ;;  %vm290_vm5 = vcmask 57344  }
  0x29   :  { %v371_v9 = vpack.c.bf16 %v52_v6, %v51_v4  ;;  %v373_v10 = vpack.c.bf16 %v70_v8, %v69_v7  ;;  %v54_v12 = vld [vmem:[#allocation6 + $0x18] sm:$0xff]  ;;  %v71_v13 = vld [vmem:[#allocation6 + $0xa0] sm:$0xff]  ;;  %v72_v14 = vld [vmem:[#allocation6 + $0xa8] sm:$0xff]  ;;  %s298_s24 = sshll.u32 %s500_s23, 4  ;;  %s299_s24 = int_to_ptr.vmem [resolvable:$true] %s298_s24 }
  0x2a   :  { %370 = vmatprep.subr.bf16.mxu0 %v369_v5  ;;  %v375_v15 = vpack.c.bf16 %v54_v12, %v53_v11  ;;  %v377_v16 = vpack.c.bf16 %v72_v14, %v71_v13  ;;  %v55_v17 = vld [vmem:[#allocation6 + $0x20] sm:$0xff]  ;;  %v56_v18 = vld [vmem:[#allocation6 + $0x28] sm:$0xff]  ;;  %v73_v19 = vld [vmem:[#allocation6 + $0xb0] sm:$0xff]  ;;  %s468_s25 = scalar_lea.vmem %s299_s24, 32  ;;  %p469_p3 = scmp.lt.s32.totalorder %s299_s24, %s299_s24 }
  0x2b   :  { %372 = vmatpush3.bf16.msra.mxu0 %v371_v9  ;;  %v74_v20 = vld [vmem:[#allocation6 + $0xb8] sm:$0xff]  ;;  %v379_v21 = vpack.c.bf16 %v56_v18, %v55_v17  ;;  %v57_v22 = vld [vmem:[#allocation6 + $0x30] sm:$0xff]  ;;  %v83_v25 = vld [vmem:[#allocation6 + $0x100] sm:$0xff]  ;;  %v256_v9 = vstv %s590_s4 }
  0x2c   :  { %374 = vmatprep.subr.bf16.mxu0 %v373_v10  ;;  %v381_v23 = vpack.c.bf16 %v74_v20, %v73_v19  ;;  %v58_v24 = vld [vmem:[#allocation6 + $0x38] sm:$0xff]  ;;  %v84_v26 = vld [vmem:[#allocation6 + $0x108] sm:$0xff]  ;;  %v75_v27 = vld [vmem:[#allocation6 + $0xc0] sm:$0xff] }
  0x2d   :  { %v76_v28 = vld [vmem:[#allocation6 + $0xc8] sm:$0xff]  ;;  %v402_v29 = vpack.c.bf16 %v84_v26, %v83_v25  ;;  %v85_v30 = vld [vmem:[#allocation6 + $0x110] sm:$0xff]  ;;  %v86_v31 = vld [vmem:[#allocation6 + $0x118] sm:$0xff]  ;;  %v383_v32 = vpack.c.bf16 %v58_v24, %v57_v22 }
  0x2e   :  { %v59_v33 = vld [vmem:[#allocation6 + $0x40] sm:$0xff]  ;;  %v405_v34 = vpack.c.bf16 %v86_v31, %v85_v30  ;;  %v49_v35 = vld [vmem:[#allocation3 + $0x8] sm:$0xff]  ;;  %v385_v36 = vpack.c.bf16 %v76_v28, %v75_v27  ;;  %v60_v37 = vld [vmem:[#allocation6 + $0x48] sm:$0xff] }
  0x2f   :  { %376 = vmatpush3.bf16.msra.mxu0 %v375_v15  ;;  %403 = vmatpush3.bf16.msra.mxu1 %v402_v29  ;;  %v87_v38 = vld [vmem:[#allocation6 + $0x120] sm:$0xff]  ;;  %v88_v39 = vld [vmem:[#allocation6 + $0x128] sm:$0xf]  ;;  %v77_v40 = vld [vmem:[#allocation6 + $0xd0] sm:$0xff]  ;;  %v387_v42 = vpack.c.bf16 %v60_v37, %v59_v33 }
  0x30   :  { %378 = vmatprep.subr.bf16.mxu0 %v377_v16  ;;  %404 = vmatprep.subr.bf16.mxu1 %v496_v0  ;;  %v78_v41 = vld [vmem:[#allocation6 + $0xd8] sm:$0xff]  ;;  %v408_v43 = vpack.c.bf16 %v88_v39, %v87_v38  ;;  %v61_v45 = vld [vmem:[#allocation6 + $0x50] sm:$0xff]  ;;  %vm409_vm3 = vmpackc.low %vm100_vm1, %vm499_vm2 }
  0x31   :  { %168 = vmatprep.mubr.f32.mxu0 %v49_v35  ;;  %v389_v44 = vpack.c.bf16 %v78_v41, %v77_v40  ;;  %v62_v46 = vld [vmem:[#allocation6 + $0x58] sm:$0xff]  ;;  %v79_v47 = vld [vmem:[#allocation6 + $0xe0] sm:$0xff]  ;;  %v80_v48 = vld [vmem:[#allocation6 + $0xe8] sm:$0xff] }
  0x32   :  { %v391_v49 = vpack.c.bf16 %v62_v46, %v61_v45  ;;  %v50_v50 = vld [vmem:[#allocation3 + $0x10] sm:$0xff]  ;;  %v393_v51 = vpack.c.bf16 %v80_v48, %v79_v47  ;;  %v63_v52 = vld [vmem:[#allocation6 + $0x60] sm:$0xff]  ;;  %v64_v53 = vld [vmem:[#allocation6 + $0x68] sm:$0xff] }
  0x33   :  { %380 = vmatpush3.bf16.msra.mxu0 %v379_v21  ;;  %406 = vmatpush3.bf16.msra.mxu1 %v405_v34  ;;  %v81_v54 = vld [vmem:[#allocation6 + $0xf0] sm:$0xff]  ;;  %v82_v55 = vld [vmem:[#allocation6 + $0xf8] sm:$0xff]  ;;  %v395_v56 = vpack.c.bf16 %v64_v53, %v63_v52  ;;  %v48_v61 = vld [vmem:[#allocation3] sm:$0xff] }
  0x34   :  { %382 = vmatprep.subr.bf16.mxu0 %v381_v23  ;;  %407 = vmatprep.subr.bf16.mxu1 %v496_v0  ;;  %v397_v57 = vpack.c.bf16 %v82_v55, %v81_v54  ;;  %v65_v58 = vld [vmem:[#allocation6 + $0x70] sm:$0xff]  ;;  %v66_v59 = vld [vmem:[#allocation6 + $0x78] sm:$0xff]  ;;  %v308_v2 = vld [vmem:[%s588_s2] ss:$0 sm:$0xff]  ;;  %s464_s2 = scalar_lea.vmem %s299_s24, 16 }
  0x35   :  { %v399_v60 = vpack.c.bf16 %v66_v59, %v65_v58  ;;  %v311_v6 = vld [vmem:[%s589_s3] ss:$0 sm:$0xff]  ;;  %p465_p2 = scmp.ne.s32.totalorder %s299_s24, %s464_s2  ;;  %p470_p4 = scmp.lt.s32.totalorder %s468_s25, %s464_s2 }
  0x37   :  { %384 = vmatpush3.bf16.msra.mxu0 %v383_v32  ;;  %410 = vmatpush3.bf16.msk.msra.mxu1 %vm409_vm3, %v408_v43  ;;  %p471_p5 = por %p470_p4, %p469_p3 }
  0x38   :  { %386 = vmatprep.subr.bf16.mxu0 %v385_v36 }
  0x39   :  { %p472_p6 = pnand %p471_p5, %p465_p2 }
  0x3a   :  { %367 = vmatmul.mubr.msk.f32.vlgmr.msra.gmra.mrb[0].mxu1 %vm96_vm4, %v50_v50 }
  0x3b   :  { %388 = vmatpush3.bf16.msra.mxu0 %v387_v42 }
  0x3c   :  { %390 = vmatprep.subr.bf16.mxu0 %v389_v44 }
  0x3f   :  { %392 = vmatpush3.bf16.msra.mxu0 %v391_v49 }
  0x40   :  { %394 = vmatprep.subr.bf16.mxu0 %v393_v51 }
  0x43   :  { %396 = vmatpush3.bf16.msra.mxu0 %v395_v56 }
  0x44   :  { %398 = vmatprep.subr.bf16.mxu0 %v397_v57 }
  0x47   :  { %400 = vmatpush3.bf16.msra.mxu0 %v399_v60 }
  0x4a   :  { %169 = vmatmul.mubr.f32.vlgmr.msra.gmra.mrb[0].mxu0 %v48_v61 }
 0x10d   :  { %v240_v62 = vpop.f32.mrb[0].mxu1 }
 0x10e   :  { %v368_v63 = vpop.f32.mrb[1].mxu1 }
 0x11d   :  { %v344_v0 = vpop.f32.mrb[0].mxu0 }
 0x11e   :  { %v345_v1 = vpop.f32.mrb[1].mxu0 }
 0x11f   :  { %v346_v3 = vadd.f32 %v345_v1, %v344_v0 }
 0x121   :  { %v171_v4 = vadd.f32 %v346_v3, %v308_v2 }
 0x123   :  { %v241_v5 = vadd.f32 %v240_v62, %v171_v4 }
 0x125   :  { %v244_v7 = vmax.f32 %v241_v5, 0.0 }
 0x127   :  { %v252_v8 = vmul.f32 %v311_v6, %v244_v7 }
 0x129   :  { %253 = vadd.xlane.f32.xlu0 %v252_v8 }
 0x1b6   :  { %v254_v10 = vpop.xlane.xlu0 %253 }
 0x1b7   :  { %v257_v11 = vadd.f32 %v256_v9, %v254_v10 }
 0x1b9   :  { %258 = vxpose.xlu0.b32.start.end [1/1] (short) (narrow) %v257_v11, 8 }
 0x239   :  { %v274_v12 = vpop.trf.xlu0 }
 0x23a   :  { %291 = vst.msk [vmem:[#allocation8] sm:$0x1] %vm290_vm5, %v274_v12 }
 0x23b   :  { %475 = shalt.err (!%p472_p6)
}
 0x23c   :  { %s476_s4 = scalar_lea.hbm %s591_s5, 16 }
 0x23d   :  { %p477_p7 = scmp.ne.s32.totalorder %s591_s5, %s476_s4  ;;  %p480_p8 = scmp.lt.u32.totalorder %s476_s4, %s591_s5 }
 0x23f   :  { %p482_p9 = pnand %p480_p8, %p477_p7 }
 0x241   :  { %485 = shalt.err (!%p482_p9)
}
 0x242   :  { %301 = dma.vmem_to_hbm [thread:$0]  %s299_s24, 16, %s591_s5, [#allocation5]  }
 0x243   :  { %490 = dma.done.wait [#allocation5], 16  }
 0x244   :  { %491 = vsyncadd [#allocation5], 4294967280 }
 0x245   :  { %305 = vsyncpa [#allocation4], 1 }
 0x246   :  { %306 = vsyncpa [#allocation7], 1 }
 0x247   :  { %307 = vsyncpa [#allocation5], 1 }

</bundles_post_ra>
